<compile_context>
chip_gen: v7x
topology: tpu7x:2x2x1
jax: 0.10.0
libtpu: 0.0.40
codegen_flags: <defaults>
</compile_context>

<pallas_src>
import functools

import jax
import jax.numpy as jnp
from jax.experimental import pallas as pl
from jax.experimental.pallas import tpu as pltpu


def _normalized_perceptual_kernel(x_ref, y_ref, wft_ref, brow_ref, wlin_ref, wb_ref,
                                  bbe_ref, wbb_ref, o_ref, acc_ref,
                                  *, tile_p, total_p, tiles_per_seg, needs_mask):
    """x_ref, y_ref: [1, C, T]; wft_ref: [F, C]; brow_ref/wlin_ref/wb_ref: [1, F];
    bbe_ref/wbb_ref: [1, 1]; o_ref: [1, 1, 8, 128]; acc_ref: VMEM [1, T] partial sums."""
    s = pl.program_id(1)      # pixel segment (v7x dual-TC split)
    p = pl.program_id(2)      # pixel tile within segment (reduction axis, last)

    @pl.when(p == 0)
    def _init():
        acc_ref[...] = jnp.zeros_like(acc_ref)
        o_ref[...] = jnp.zeros_like(o_ref)    # defensive: o_ref defined even pre-finalize

    f32 = jnp.float32
    xb = x_ref[0].astype(f32)                 # [C, T] (bf16 inputs cast here)
    yb = y_ref[0].astype(f32)

    wft = wft_ref[...]                                            # [F, C]
    gx = jnp.dot(wft, xb, preferred_element_type=f32)             # [F, T]  MXU
    gy = jnp.dot(wft, yb, preferred_element_type=f32)             # [F, T]  MXU

    F = gx.shape[0]
    ones_f = jnp.ones((1, F), f32)
    brow = brow_ref[...]                                          # [1, F]

    # ||g - b||^2 = ones@(g*g) - 2*b@g + (||b||^2 + eps): F-axis reductions on the MXU.
    sqx = jnp.dot(ones_f, gx * gx, preferred_element_type=f32)    # [1, T]
    sqy = jnp.dot(ones_f, gy * gy, preferred_element_type=f32)
    bx = jnp.dot(brow, gx, preferred_element_type=f32)            # [1, T]
    by = jnp.dot(brow, gy, preferred_element_type=f32)

    eps = f32(0.25e-10)   # = 1e-10 / 4: exact fold of the normalize=True 2x scale
    nx = jnp.maximum(sqx - 2.0 * bx + bbe_ref[...], eps)          # clamp kills rounding<0
    ny = jnp.maximum(sqy - 2.0 * by + bbe_ref[...], eps)
    rx = jax.lax.rsqrt(nx)                                        # [1, T]  EUP
    ry = jax.lax.rsqrt(ny)

    # d = (gx-b)*rx - (gy-b)*ry = u - b*c; the weighted F-reduction of d^2 expands into
    # three MXU dots so the bias never costs an [F, T] VALU op.
    u = gx * rx - gy * ry                                         # [F, T]
    c = rx - ry                                                   # [1, T]

    t1 = jnp.dot(wlin_ref[...], u * u, preferred_element_type=f32)   # [1, T]
    t2 = jnp.dot(wb_ref[...], u, preferred_element_type=f32)         # [1, T]
    contrib = t1 - 2.0 * c * t2 + (c * c) * wbb_ref[...]             # [1, T]

    if needs_mask:   # static: only when P is ragged / the segment grid is padded
        gp = s * tiles_per_seg + p
        lane = jax.lax.broadcasted_iota(jnp.int32, (1, tile_p), 1)
        valid = (gp * tile_p + lane) < total_p
        contrib = jnp.where(valid, contrib, 0.0)      # select: NaN-safe for padded lanes

    # wlin already carries the 1/P spatial mean -> plain lane-resident accumulate
    acc_ref[...] += contrib

    @pl.when(p == pl.num_programs(2) - 1)
    def _finalize():
        total = jnp.sum(acc_ref[...], axis=1, keepdims=True)      # [1, 1] lane reduce
        o_ref[...] = jnp.broadcast_to(total, o_ref.shape)         # lane-dense slab write


def normalized_loss(x_nchw, y_nchw, w_feat, w_lin, *, tile_p=None, num_segments=None):
    """Equivalent of NormalizedLoss.forward(x, y) with the synthetic perceptual loss_fn."""
    B, C, H, W = x_nchw.shape
    P = H * W
    F = w_feat.shape[1]

    # Pure reshape of NCHW (no data movement): channels on sublanes, pixels on lanes.
    x = x_nchw.reshape(B, C, P)
    y = y_nchw.reshape(B, C, P)

    if tile_p is None:
        # 16K lanes: grid-step overhead amortized, safe for v7x's 64 MiB VMEM.
        # v5e/v6e (128 MiB VMEM) can pass 32768/65536 for a few extra percent.
        tile_p = min(16384, pl.cdiv(P, 128) * 128)
    num_pt = pl.cdiv(P, tile_p)

    if num_segments is None:
        # v7x has 2 TensorCores; when B == 1 the batch axis can't feed both, so split the
        # pixel axis into two parallel segments (partials summed below). No-op on 1-TC chips.
        num_segments = 2 if (B == 1 and num_pt >= 2) else 1
    tiles_per_seg = pl.cdiv(num_pt, num_segments)
    seg_padded = tiles_per_seg * num_segments != num_pt
    needs_mask = (P % tile_p != 0) or seg_padded

    # Tiny per-feature constants, computed once in the wrapper (not per tile):
    wft = jnp.transpose(w_feat).astype(jnp.float32)                          # [F, C]
    bias = (0.5 * jnp.sum(w_feat.astype(jnp.float32), axis=0))               # [F]
    b_row = bias.reshape(1, F)                                               # [1, F]
    wlin_row = (w_lin.astype(jnp.float32).reshape(1, F) / P)                 # [1, F] (1/P mean folded)
    wb_row = wlin_row * b_row                                                # [1, F]
    bbe = (jnp.sum(bias * bias) + jnp.float32(0.25e-10)).reshape(1, 1)       # ||b||^2 + eps
    wbb = jnp.sum(wb_row * b_row).reshape(1, 1)                              # sum wlin/P * b^2

    last_blk = num_pt - 1
    if seg_padded:
        # Clamp fully out-of-range pixel blocks to the last real block; their
        # contribution is zeroed by the in-kernel lane mask.
        def pix_blk(seg, pt):
            return jnp.minimum(seg * tiles_per_seg + pt, last_blk)
    else:
        def pix_blk(seg, pt):
            return seg * tiles_per_seg + pt

    kernel = functools.partial(
        _normalized_perceptual_kernel,
        tile_p=tile_p, total_p=P, tiles_per_seg=tiles_per_seg, needs_mask=needs_mask)

    # Scoped-VMEM budget from the F-scaled [F, T] f32 temporaries (generous 8 live copies).
    vmem_limit = int(min(64 * 1024 * 1024, max(32 * 1024 * 1024, 8 * F * tile_p * 4)))

    out = pl.pallas_call(
        kernel,
        out_shape=jax.ShapeDtypeStruct((B, num_segments, 8, 128), jnp.float32),
        grid=(B, num_segments, tiles_per_seg),          # reduction (pixel) axis last
        in_specs=[
            pl.BlockSpec((1, C, tile_p), lambda b, s, p: (b, 0, pix_blk(s, p))),
            pl.BlockSpec((1, C, tile_p), lambda b, s, p: (b, 0, pix_blk(s, p))),
            pl.BlockSpec((F, C), lambda b, s, p: (0, 0)),
            pl.BlockSpec((1, F), lambda b, s, p: (0, 0)),
            pl.BlockSpec((1, F), lambda b, s, p: (0, 0)),
            pl.BlockSpec((1, F), lambda b, s, p: (0, 0)),
            pl.BlockSpec((1, 1), lambda b, s, p: (0, 0)),
            pl.BlockSpec((1, 1), lambda b, s, p: (0, 0)),
        ],
        out_specs=pl.BlockSpec((1, 1, 8, 128), lambda b, s, p: (b, s, 0, 0)),
        scratch_shapes=[pltpu.VMEM((1, tile_p), jnp.float32)],
        compiler_params=pltpu.CompilerParams(
            dimension_semantics=("parallel", "parallel", "arbitrary"),
            vmem_limit_bytes=vmem_limit),
    )(x, y, wft, b_row, wlin_row, wb_row, bbe, wbb)

    per_seg = out[:, :, 0, 0]                            # [B, S] partial sums
    # LPIPS-style output shape: one scalar per sample, (B, 1, 1, 1)
    return jnp.sum(per_seg, axis=1).reshape(B, 1, 1, 1)


def _reference(x_nchw, y_nchw, w_feat, w_lin):
    """Pure-JAX reference with the original (un-folded) normalize=True semantics."""
    B, C, H, W = x_nchw.shape
    x = jnp.transpose(x_nchw, (0, 2, 3, 1)).reshape(B, H * W, C).astype(jnp.float32) * 2.0 - 1.0
    y = jnp.transpose(y_nchw, (0, 2, 3, 1)).reshape(B, H * W, C).astype(jnp.float32) * 2.0 - 1.0
    fx = jnp.einsum("bpc,cf->bpf", x, w_feat)
    fy = jnp.einsum("bpc,cf->bpf", y, w_feat)
    fx = fx * jax.lax.rsqrt(jnp.sum(fx * fx, axis=-1, keepdims=True) + 1e-10)
    fy = fy * jax.lax.rsqrt(jnp.sum(fy * fy, axis=-1, keepdims=True) + 1e-10)
    d = (fx - fy) ** 2
    score = jnp.sum(d * w_lin[0][None, None, :], axis=-1)
    return jnp.mean(score, axis=-1).reshape(B, 1, 1, 1)


if __name__ == "__main__":
    root = jax.random.PRNGKey(0)
    kwf, kwl, kdata = jax.random.split(root, 3)

    C, FEAT = 4, 32
    # deterministic synthetic parameters of the wrapped perceptual loss_fn
    w_feat = 0.1 * jax.random.normal(kwf, (C, FEAT), dtype=jnp.float32)     # 1x1 conv "backbone"
    w_lin = jnp.abs(jax.random.normal(kwl, (1, FEAT), dtype=jnp.float32))   # nonneg LPIPS lin weights

    def check(case, B, H, W, **kw):
        kx, ky = jax.random.split(jax.random.fold_in(kdata, case), 2)
        x = jax.random.uniform(kx, (B, C, H, W), dtype=jnp.float32)  # images in [0, 1], NCHW
        y = jax.random.uniform(ky, (B, C, H, W), dtype=jnp.float32)
        out = jax.block_until_ready(normalized_loss(x, y, w_feat, w_lin, **kw))
        ref = _reference(x, y, w_feat, w_lin)
        assert out.shape == (B, 1, 1, 1), (case, out.shape)
        assert jnp.allclose(out, ref, rtol=1e-3, atol=1e-5), (case, out, ref)

    check(0, 2, 16, 16, tile_p=128)                    # multi-tile accumulate/finalize path
    check(1, 2, 16, 16)                                # default tile_p (single tile per sample)
    check(2, 1, 13, 13, tile_p=128, num_segments=2)    # ragged last tile + B==1 dual-segment split
    check(3, 1, 10, 10, tile_p=128, num_segments=2)    # segment-padded grid (clamped OOB tile, masked)

    print("KERNEL_OK")
</pallas_src>

<mosaic_0001>
module attributes {stable_mosaic.version = 11 : i64} {
  func.func @_normalized_perceptual_kernel(%arg0: i32, %arg1: i32, %arg2: i32, %arg3: memref<1x4x128xf32, #tpu.memory_space<vmem>>, %arg4: memref<1x4x128xf32, #tpu.memory_space<vmem>>, %arg5: memref<32x4xf32, #tpu.memory_space<vmem>>, %arg6: memref<1x32xf32, #tpu.memory_space<vmem>>, %arg7: memref<1x32xf32, #tpu.memory_space<vmem>>, %arg8: memref<1x32xf32, #tpu.memory_space<vmem>>, %arg9: memref<1x1xf32, #tpu.memory_space<vmem>>, %arg10: memref<1x1xf32, #tpu.memory_space<vmem>>, %arg11: memref<1x1x8x128xf32, #tpu.memory_space<vmem>>, %arg12: memref<1x128xf32, #tpu.memory_space<vmem>>) attributes {dimension_semantics = [#tpu.dimension_semantics<parallel>, #tpu.dimension_semantics<parallel>, #tpu.dimension_semantics<arbitrary>], iteration_bounds = array<i64: 2, 1, 2>, scalar_prefetch = 0 : i64, scratch_operands = 1 : i64, tpu.core_type = #tpu.core_type<tc>, window_params = [{transform_indices = @transform_0, window_bounds = array<i64: 1, 4, 128>}, {transform_indices = @transform_1, window_bounds = array<i64: 1, 4, 128>}, {pipeline_mode = #tpu.pipeline_mode<synchronous>, transform_indices = @transform_2, window_bounds = array<i64: 32, 4>}, {pipeline_mode = #tpu.pipeline_mode<synchronous>, transform_indices = @transform_3, window_bounds = array<i64: 1, 32>}, {pipeline_mode = #tpu.pipeline_mode<synchronous>, transform_indices = @transform_4, window_bounds = array<i64: 1, 32>}, {pipeline_mode = #tpu.pipeline_mode<synchronous>, transform_indices = @transform_5, window_bounds = array<i64: 1, 32>}, {pipeline_mode = #tpu.pipeline_mode<synchronous>, transform_indices = @transform_6, window_bounds = array<i64: 1, 1>}, {pipeline_mode = #tpu.pipeline_mode<synchronous>, transform_indices = @transform_7, window_bounds = array<i64: 1, 1>}, {transform_indices = @transform_8, window_bounds = array<i64: 1, 1, 8, 128>}]} {
    %c0_i32 = arith.constant 0 : i32
    %0 = arith.cmpi eq, %arg2, %c0_i32 : i32
    %1 = arith.extui %0 : i1 to i32
    %c0_i32_0 = arith.constant 0 : i32
    %2 = arith.cmpi ne, %1, %c0_i32_0 : i32
    scf.if %2 {
      %cst_38 = arith.constant 0.000000e+00 : f32
      %62 = vector.broadcast %cst_38 : f32 to vector<1x128xf32>
      %c0_39 = arith.constant 0 : index
      %c0_40 = arith.constant 0 : index
      %63 = vector.load %arg12[%c0_39, %c0_40] : memref<1x128xf32, #tpu.memory_space<vmem>>, vector<1x128xf32>
      tpu.vector_store %arg12[%c0_39, %c0_40], %62 {strides = array<i32>} : memref<1x128xf32, #tpu.memory_space<vmem>>, vector<1x128xf32>,
      %cst_41 = arith.constant 0.000000e+00 : f32
      %64 = vector.broadcast %cst_41 : f32 to vector<1x1x8x128xf32>
      %c0_42 = arith.constant 0 : index
      %c0_43 = arith.constant 0 : index
      %c0_44 = arith.constant 0 : index
      %c0_45 = arith.constant 0 : index
      %65 = vector.load %arg11[%c0_42, %c0_43, %c0_44, %c0_45] : memref<1x1x8x128xf32, #tpu.memory_space<vmem>>, vector<1x1x8x128xf32>
      tpu.vector_store %arg11[%c0_42, %c0_43, %c0_44, %c0_45], %64 {strides = array<i32>} : memref<1x1x8x128xf32, #tpu.memory_space<vmem>>, vector<1x1x8x128xf32>,
    } else {
    }
    %c0 = arith.constant 0 : index
    %c0_1 = arith.constant 0 : index
    %c0_2 = arith.constant 0 : index
    %3 = vector.load %arg3[%c0, %c0_1, %c0_2] : memref<1x4x128xf32, #tpu.memory_space<vmem>>, vector<1x4x128xf32>
    %4 = vector.shape_cast %3 : vector<1x4x128xf32> to vector<4x128xf32>
    %c0_3 = arith.constant 0 : index
    %c0_4 = arith.constant 0 : index
    %c0_5 = arith.constant 0 : index
    %5 = vector.load %arg4[%c0_3, %c0_4, %c0_5] : memref<1x4x128xf32, #tpu.memory_space<vmem>>, vector<1x4x128xf32>
    %6 = vector.shape_cast %5 : vector<1x4x128xf32> to vector<4x128xf32>
    %c0_6 = arith.constant 0 : index
    %c0_7 = arith.constant 0 : index
    %7 = vector.load %arg5[%c0_6, %c0_7] : memref<32x4xf32, #tpu.memory_space<vmem>>, vector<32x4xf32>
    %cst = arith.constant dense<0.000000e+00> : vector<32x128xf32>
    %8 = tpu.matmul %7, %4, %cst {dimension_numbers = #tpu.dot_dimension_numbers<[1], [0], [0], [1], [0, 0, 1, 1], [], []>} : vector<32x4xf32>, vector<4x128xf32>, vector<32x128xf32> -> vector<32x128xf32>
    %cst_8 = arith.constant dense<0.000000e+00> : vector<32x128xf32>
    %9 = tpu.matmul %7, %6, %cst_8 {dimension_numbers = #tpu.dot_dimension_numbers<[1], [0], [0], [1], [0, 0, 1, 1], [], []>} : vector<32x4xf32>, vector<4x128xf32>, vector<32x128xf32> -> vector<32x128xf32>
    %cst_9 = arith.constant 1.000000e+00 : f32
    %10 = vector.broadcast %cst_9 : f32 to vector<1x32xf32>
    %c0_10 = arith.constant 0 : index
    %c0_11 = arith.constant 0 : index
    %11 = vector.load %arg6[%c0_10, %c0_11] : memref<1x32xf32, #tpu.memory_space<vmem>>, vector<1x32xf32>
    %12 = arith.mulf %8, %8 : vector<32x128xf32>
    %cst_12 = arith.constant dense<0.000000e+00> : vector<1x128xf32>
    %13 = tpu.matmul %10, %12, %cst_12 {dimension_numbers = #tpu.dot_dimension_numbers<[1], [0], [0], [1], [0, 0, 1, 1], [], []>} : vector<1x32xf32>, vector<32x128xf32>, vector<1x128xf32> -> vector<1x128xf32>
    %14 = arith.mulf %9, %9 : vector<32x128xf32>
    %cst_13 = arith.constant dense<0.000000e+00> : vector<1x128xf32>
    %15 = tpu.matmul %10, %14, %cst_13 {dimension_numbers = #tpu.dot_dimension_numbers<[1], [0], [0], [1], [0, 0, 1, 1], [], []>} : vector<1x32xf32>, vector<32x128xf32>, vector<1x128xf32> -> vector<1x128xf32>
    %cst_14 = arith.constant dense<0.000000e+00> : vector<1x128xf32>
    %16 = tpu.matmul %11, %8, %cst_14 {dimension_numbers = #tpu.dot_dimension_numbers<[1], [0], [0], [1], [0, 0, 1, 1], [], []>} : vector<1x32xf32>, vector<32x128xf32>, vector<1x128xf32> -> vector<1x128xf32>
    %cst_15 = arith.constant dense<0.000000e+00> : vector<1x128xf32>
    %17 = tpu.matmul %11, %9, %cst_15 {dimension_numbers = #tpu.dot_dimension_numbers<[1], [0], [0], [1], [0, 0, 1, 1], [], []>} : vector<1x32xf32>, vector<32x128xf32>, vector<1x128xf32> -> vector<1x128xf32>
    %cst_16 = arith.constant 2.000000e+00 : f32
    %18 = vector.broadcast %cst_16 : f32 to vector<1x128xf32>
    %19 = arith.mulf %18, %16 : vector<1x128xf32>
    %20 = arith.subf %13, %19 : vector<1x128xf32>
    %c0_17 = arith.constant 0 : index
    %c0_18 = arith.constant 0 : index
    %21 = vector.load %arg9[%c0_17, %c0_18] : memref<1x1xf32, #tpu.memory_space<vmem>>, vector<1x1xf32>
    %22 = vector.broadcast %21 : vector<1x1xf32> to vector<1x128xf32>
    %23 = arith.addf %20, %22 : vector<1x128xf32>
    %cst_19 = arith.constant 2.500000e-11 : f32
    %24 = vector.broadcast %cst_19 : f32 to vector<1x128xf32>
    %25 = arith.maximumf %23, %24 : vector<1x128xf32>
    %cst_20 = arith.constant 2.000000e+00 : f32
    %26 = vector.broadcast %cst_20 : f32 to vector<1x128xf32>
    %27 = arith.mulf %26, %17 : vector<1x128xf32>
    %28 = arith.subf %15, %27 : vector<1x128xf32>
    %c0_21 = arith.constant 0 : index
    %c0_22 = arith.constant 0 : index
    %29 = vector.load %arg9[%c0_21, %c0_22] : memref<1x1xf32, #tpu.memory_space<vmem>>, vector<1x1xf32>
    %30 = vector.broadcast %29 : vector<1x1xf32> to vector<1x128xf32>
    %31 = arith.addf %28, %30 : vector<1x128xf32>
    %cst_23 = arith.constant 2.500000e-11 : f32
    %32 = vector.broadcast %cst_23 : f32 to vector<1x128xf32>
    %33 = arith.maximumf %31, %32 : vector<1x128xf32>
    %34 = math.rsqrt %25 : vector<1x128xf32>
    %35 = math.rsqrt %33 : vector<1x128xf32>
    %36 = vector.broadcast %34 : vector<1x128xf32> to vector<32x128xf32>
    %37 = arith.mulf %8, %36 : vector<32x128xf32>
    %38 = vector.broadcast %35 : vector<1x128xf32> to vector<32x128xf32>
    %39 = arith.mulf %9, %38 : vector<32x128xf32>
    %40 = arith.subf %37, %39 : vector<32x128xf32>
    %41 = arith.subf %34, %35 : vector<1x128xf32>
    %c0_24 = arith.constant 0 : index
    %c0_25 = arith.constant 0 : index
    %42 = vector.load %arg7[%c0_24, %c0_25] : memref<1x32xf32, #tpu.memory_space<vmem>>, vector<1x32xf32>
    %43 = arith.mulf %40, %40 : vector<32x128xf32>
    %cst_26 = arith.constant dense<0.000000e+00> : vector<1x128xf32>
    %44 = tpu.matmul %42, %43, %cst_26 {dimension_numbers = #tpu.dot_dimension_numbers<[1], [0], [0], [1], [0, 0, 1, 1], [], []>} : vector<1x32xf32>, vector<32x128xf32>, vector<1x128xf32> -> vector<1x128xf32>
    %c0_27 = arith.constant 0 : index
    %c0_28 = arith.constant 0 : index
    %45 = vector.load %arg8[%c0_27, %c0_28] : memref<1x32xf32, #tpu.memory_space<vmem>>, vector<1x32xf32>
    %cst_29 = arith.constant dense<0.000000e+00> : vector<1x128xf32>
    %46 = tpu.matmul %45, %40, %cst_29 {dimension_numbers = #tpu.dot_dimension_numbers<[1], [0], [0], [1], [0, 0, 1, 1], [], []>} : vector<1x32xf32>, vector<32x128xf32>, vector<1x128xf32> -> vector<1x128xf32>
    %cst_30 = arith.constant 2.000000e+00 : f32
    %47 = vector.broadcast %cst_30 : f32 to vector<1x128xf32>
    %48 = arith.mulf %47, %41 : vector<1x128xf32>
    %49 = arith.mulf %48, %46 : vector<1x128xf32>
    %50 = arith.subf %44, %49 : vector<1x128xf32>
    %51 = arith.mulf %41, %41 : vector<1x128xf32>
    %c0_31 = arith.constant 0 : index
    %c0_32 = arith.constant 0 : index
    %52 = vector.load %arg10[%c0_31, %c0_32] : memref<1x1xf32, #tpu.memory_space<vmem>>, vector<1x1xf32>
    %53 = vector.broadcast %52 : vector<1x1xf32> to vector<1x128xf32>
    %54 = arith.mulf %51, %53 : vector<1x128xf32>
    %55 = arith.addf %50, %54 : vector<1x128xf32>
    %c0_33 = arith.constant 0 : index
    %c0_34 = arith.constant 0 : index
    %56 = vector.load %arg12[%c0_33, %c0_34] : memref<1x128xf32, #tpu.memory_space<vmem>>, vector<1x128xf32>
    %57 = arith.addf %56, %55 : vector<1x128xf32>
    %c0_35 = arith.constant 0 : index
    %c0_36 = arith.constant 0 : index
    %58 = vector.load %arg12[%c0_35, %c0_36] : memref<1x128xf32, #tpu.memory_space<vmem>>, vector<1x128xf32>
    tpu.vector_store %arg12[%c0_35, %c0_36], %57 {strides = array<i32>} : memref<1x128xf32, #tpu.memory_space<vmem>>, vector<1x128xf32>,
    %c1_i32 = arith.constant 1 : i32
    %59 = arith.cmpi eq, %arg2, %c1_i32 : i32
    %60 = arith.extui %59 : i1 to i32
    %c0_i32_37 = arith.constant 0 : i32
    %61 = arith.cmpi ne, %60, %c0_i32_37 : i32
    scf.if %61 {
      %c0_38 = arith.constant 0 : index
      %c0_39 = arith.constant 0 : index
      %62 = vector.load %arg12[%c0_38, %c0_39] : memref<1x128xf32, #tpu.memory_space<vmem>>, vector<1x128xf32>
      %cst_40 = arith.constant dense<0.000000e+00> : vector<1xf32>
      %63 = vector.multi_reduction <add>, %62, %cst_40 [1] : vector<1x128xf32> to vector<1xf32>
      %64 = vector.shape_cast %63 : vector<1xf32> to vector<1x1xf32>
      %65 = vector.shape_cast %64 : vector<1x1xf32> to vector<1x1x1x1xf32>
      %66 = vector.broadcast %65 : vector<1x1x1x1xf32> to vector<1x1x8x128xf32>
      %c0_41 = arith.constant 0 : index
      %c0_42 = arith.constant 0 : index
      %c0_43 = arith.constant 0 : index
      %c0_44 = arith.constant 0 : index
      %67 = vector.load %arg11[%c0_41, %c0_42, %c0_43, %c0_44] : memref<1x1x8x128xf32, #tpu.memory_space<vmem>>, vector<1x1x8x128xf32>
      tpu.vector_store %arg11[%c0_41, %c0_42, %c0_43, %c0_44], %66 {strides = array<i32>} : memref<1x1x8x128xf32, #tpu.memory_space<vmem>>, vector<1x1x8x128xf32>,
    } else {
    }
    return
  }
  func.func @transform_0(%arg0: i32, %arg1: i32, %arg2: i32) -> (i32, i32, i32) {
    %c2_i32 = arith.constant 2 : i32
    %0 = arith.muli %arg1, %c2_i32 : i32
    %1 = arith.addi %0, %arg2 : i32
    %c0_i32 = arith.constant 0 : i32
    %c0_i32_0 = arith.constant 0 : i32
    return %arg0, %c0_i32, %1 : i32, i32, i32
  }
  func.func @transform_1(%arg0: i32, %arg1: i32, %arg2: i32) -> (i32, i32, i32) {
    %c2_i32 = arith.constant 2 : i32
    %0 = arith.muli %arg1, %c2_i32 : i32
    %1 = arith.addi %0, %arg2 : i32
    %c0_i32 = arith.constant 0 : i32
    %c0_i32_0 = arith.constant 0 : i32
    return %arg0, %c0_i32, %1 : i32, i32, i32
  }
  func.func @transform_2(%arg0: i32, %arg1: i32, %arg2: i32) -> (i32, i32) {
    %c0_i32 = arith.constant 0 : i32
    %c0_i32_0 = arith.constant 0 : i32
    %c0_i32_1 = arith.constant 0 : i32
    return %c0_i32, %c0_i32_0 : i32, i32
  }
  func.func @transform_3(%arg0: i32, %arg1: i32, %arg2: i32) -> (i32, i32) {
    %c0_i32 = arith.constant 0 : i32
    %c0_i32_0 = arith.constant 0 : i32
    %c0_i32_1 = arith.constant 0 : i32
    return %c0_i32, %c0_i32_0 : i32, i32
  }
  func.func @transform_4(%arg0: i32, %arg1: i32, %arg2: i32) -> (i32, i32) {
    %c0_i32 = arith.constant 0 : i32
    %c0_i32_0 = arith.constant 0 : i32
    %c0_i32_1 = arith.constant 0 : i32
    return %c0_i32, %c0_i32_0 : i32, i32
  }
  func.func @transform_5(%arg0: i32, %arg1: i32, %arg2: i32) -> (i32, i32) {
    %c0_i32 = arith.constant 0 : i32
    %c0_i32_0 = arith.constant 0 : i32
    %c0_i32_1 = arith.constant 0 : i32
    return %c0_i32, %c0_i32_0 : i32, i32
  }
  func.func @transform_6(%arg0: i32, %arg1: i32, %arg2: i32) -> (i32, i32) {
    %c0_i32 = arith.constant 0 : i32
    %c0_i32_0 = arith.constant 0 : i32
    %c0_i32_1 = arith.constant 0 : i32
    return %c0_i32, %c0_i32_0 : i32, i32
  }
  func.func @transform_7(%arg0: i32, %arg1: i32, %arg2: i32) -> (i32, i32) {
    %c0_i32 = arith.constant 0 : i32
    %c0_i32_0 = arith.constant 0 : i32
    %c0_i32_1 = arith.constant 0 : i32
    return %c0_i32, %c0_i32_0 : i32, i32
  }
  func.func @transform_8(%arg0: i32, %arg1: i32, %arg2: i32) -> (i32, i32, i32, i32) {
    %c0_i32 = arith.constant 0 : i32
    %c0_i32_0 = arith.constant 0 : i32
    %c0_i32_1 = arith.constant 0 : i32
    return %arg0, %arg1, %c0_i32, %c0_i32_0 : i32, i32, i32, i32
  }
}

</mosaic_0001>

<bundles_post_ra>
// kernel: tpu_custom_call.1
= control target key start
LH: loop header
LB: loop body
LE: loop exit
PB: predicated region body
PF: predicated region fallthrough
CT: control target
= control target key end

     0   :  { %s1904_s0 = inlined_call_operand.vmem [shape: f32[2,4,256], index: 0, kind: input, shape index: {}]   ;;  %s1905_s1 = inlined_call_operand.vmem [shape: f32[2,4,256], index: 1, kind: input, shape index: {}]   ;;  %s1906_s2 = inlined_call_operand.vmem [shape: f32[32,4], index: 2, kind: input, shape index: {}]   ;;  %s1907_s3 = inlined_call_operand.vmem [shape: f32[1,32], index: 3, kind: input, shape index: {}]   ;;  %s1908_s4 = inlined_call_operand.vmem [shape: f32[1,32], index: 4, kind: input, shape index: {}]   ;;  %s1909_s5 = inlined_call_operand.vmem [shape: f32[1,32], index: 5, kind: input, shape index: {}]   ;;  %s1910_s6 = inlined_call_operand.<no memory space> [shape: f32[1,1], index: 6, kind: input, shape index: {}]   ;;  %s1911_s8 = inlined_call_operand.hbm [shape: f32[2,1,8,128], index: 8, kind: output, shape index: {}]   ;;  %s1912_s7 = inlined_call_operand.<no memory space> [shape: f32[1,1], index: 7, kind: input, shape index: {}]  }
   0x1   :  { %v13_v0 = vstv %s1910_s6  ;;  %v15_v1 = vstv %s1912_s7 }
   0x2   :  { %14 = vst [vmem:[#allocation3] sm:$0x1] %v13_v0  ;;  %16 = vst [vmem:[#allocation4] sm:$0x1] %v15_v1 }
   0x3   :  { %17 = vsyncpa [#allocation6], 0 }
   0x4   :  { %19 = vsyncpa [#allocation6 + $0x1], 0  ;;  %s1662_s9 = smov 0   ;;  %s1664_s10 = smov 0  }
   0x5   :  { %s1666_s11 = smov 0   ;;  %s1668_s12 = smov 0  }
   0x6   :  { %s1670_s13 = smov 0   ;;  %s1672_s14 = smov 0  }
   0x7   :  { %s1674_s6 = smov 0   ;;  %s1676_s15 = smov 0  }
   0x8 LB: > { %1915 = sst [smem:[#allocation8_spill]] %s1598_s6  ;;  %s1236_s7 = sadd.s32 4294967295, %s1602_s15   ;;  %s1602_s15 = sphi %s1676_s15, %s25_s15   ;;  %s1598_s6 = sphi %s1674_s6, %s1922_s6   ;;  %s1594_s14 = sphi %s1672_s14, %s1927_s14   ;;  %s1590_s13 = sphi %s1670_s13, %s1920_s13   ;;  %s1586_s12 = sphi %s1668_s12, %s1926_s12   ;;  %s1582_s11 = sphi %s1666_s11, %s1925_s11   ;;  %s1578_s10 = sphi %s1664_s10, %s1924_s10   ;;  %s1574_s9 = sphi %s1662_s9, %s1923_s9  }
   0x9   : > { %s1237_s16 = sadd.s32 4294967294, %s1602_s15   ;;  %s37_s17 = sadd.s32 1, %s1594_s14 }
   0xa   : > { %p38_p0 = scmp.ge.s32.totalorder %s37_s17, 2  ;;  %s44_s18 = sadd.s32 1, %s1598_s6 }
   0xb   : > { %p253_p1 = scmp.ne.s32.totalorder %s1582_s11, %s1578_s10  ;;  %p254_p2 = scmp.eq.s32.totalorder %s1236_s7, 3 }
   0xc   : > { %s1929_s17 = smov (%p38_p0, %s37_s17), 0  ;;  %s1931_s18 = smov (!%p38_p0, %s44_s18), %s1598_s6 }
   0xd   : > { %1916 = sst [smem:[#allocation9_spill]] %s1929_s17  ;;  %p1711_p3 = por %p254_p2, %p253_p1 }
   0xe   : > { %p259_p4 = scmp.ne.s32.totalorder %s1578_s10, %s1574_s9  ;;  %p46_p5 = scmp.ge.s32.totalorder %s1931_s18, 2 }
   0xf   : > { %p260_p6 = scmp.eq.s32.totalorder %s1237_s16, 3  ;;  %p1240_p7 = scmp.ge.s32.totalorder %s1602_s15, 1 }
  0x10   : > { %p326_p8 = scmp.lt.s32.totalorder %s1602_s15, 5  ;;  %s1933_s18 = smov (%p46_p5, %s1931_s18), 0 }
  0x11   : > { %1918 = sst [smem:[#allocation10_spill]] %s1933_s18  ;;  %p1721_p9 = por %p260_p6, %p259_p4 }
  0x12   : > { %p327_p10 = pnand %p1240_p7, %p326_p8  ;;  %s238_s21 = ssub.s32 %s1598_s6, %s1933_s18 }
  0x13   : > { %s243_s22 = sadd.s32 1, %s1582_s11  ;;  %p241_p11 = scmp.eq.s32.totalorder %s238_s21, 0 }
  0x14   : > { %330 = sbr.rel (%p327_p10) target bundleno = 917 (0x395), region = 52  ;;  %s372_s24 = sand.u32 (!%p327_p10), 1, %s1578_s10  }
  0x15   : > { %s1729_s23 = scalar_select %p241_p11, %s1582_s11, %s243_s22  }
  0x16   : > { %p377_p12 = scmp.lt.s32.totalorder (!%p327_p10), %s1590_s13, 1  ;;  %s1241_s25 = sshll.u32 (!%p327_p10), %s372_s24, 3 }
  0x17   : > { %p379_p13 = scmp.lt.s32.totalorder (!%p327_p10), %s1586_s12, 1  ;;  %s1744_s6 = scalar_lea.vmem (!%p327_p10), [#allocation5], %s1241_s25 }
  0x18   : > { %p1246_p0 = scmp.ne.s32.totalorder (!%p327_p10), %s1586_s12, 0 }
  0x1b   : > { %s378_s26 = scalar_select %p377_p12, %s1590_s13, 1 }
  0x1c   : > { %s380_s27 = scalar_select %p379_p13, %s1586_s12, 1 }
  0x1d   : > { %s1242_s28 = sshll.u32 %s378_s26, 1  ;;  %402 = sbr.rel (%p1246_p0) target bundleno = 36 (0x24), region = 56  ;;  %v1604_v2 = vmov (!%p1246_p0), 0.0  }
  0x1e   : > { %s382_s29 = sadd.s32 %s1242_s28, %s380_s27  ;;  %403 = vst [vmem:[#allocation2] sm:$0x1] (!%p1246_p0), %v1604_v2  ;;  %404 = vst [vmem:[%s1744_s6] sm:$0xff] (!%p1246_p0), %v1604_v2 }
  0x1f   : > { %s1243_s30 = sshll.u32 %s382_s29, 2 }
  0x20   : > { %s384_s21 = scalar_lea.vmem %s1904_s0, %s1243_s30  ;;  %s396_s17 = scalar_lea.vmem %s1905_s1, %s1243_s30 }
  0x24 PF: > { %v405_v3 = vld [vmem:[%s384_s21] sm:$0xf]  ;;  %vm424_vm0 = vcmask 1043456   ;;  %vm411_vm1 = vcmask 31744   ;;  %v408_v6 = vld [vmem:[%s1906_s2 + $0x8] sm:$0xff]  ;;  %v409_v7 = vld [vmem:[%s1906_s2 + $0x10] sm:$0xff]  ;;  %v905_v40 = vlaneseq }
  0x25   : > { %v406_v4 = vld [vmem:[%s396_s17] sm:$0xf]  ;;  %1308 = vmatprep.subr.msk.mxu0 %vm424_vm0, %v405_v3  ;;  %v410_v8 = vld [vmem:[%s1906_s2 + $0x18] sm:$0xff]  ;;  %v1605_v9 = vmov 0.0|0.0   ;;  %vm1606_vm2 = vmmov 0   ;;  %v1607_v10 = vmov 0.0  }
  0x26   : > { %v407_v5 = vld [vmem:[%s1906_s2] sm:$0xff]  ;;  %1316 = vmatprep.subr.msk.mxu1 %vm424_vm0, %v406_v4  ;;  %1309 = vmatpush3.msk.msra.mxu0 %vm424_vm0, %v405_v3  ;;  %v1608_v12 = vmov 0   ;;  %vm606_vm3 = vcmask 261120   ;;  %v1609_v38 = vmov 1.0   ;;  %v906_v44 = vshrl.u32 %v905_v40, 7  ;;  %p1263_p1 = scmp.ne.s32.totalorder %s1586_s12, 1 }
  0x27   : > { %1310 = vmatprep.mubr.msk.f32.mxu0 %vm411_vm1, %v407_v5  ;;  %1317 = vmatpush3.msk.msra.mxu1 %vm424_vm0, %v406_v4  ;;  %v899_v11 = vld [vmem:[#allocation3] sm:$0x1]  ;;  %v1094_v13 = vld [vmem:[#allocation4] sm:$0x1]  ;;  %v601_v39 = vld [vmem:[%s1907_s3] sm:$0x1] }
  0x28   : > { %1318 = vmatprep.mubr.msk.f32.mxu1 %vm411_vm1, %v407_v5  ;;  %1311 = vmatmul.mubr.msk.f32.vlgmr.msra.gmra.mrb[0].mxu0 %vm411_vm1, %v408_v6  ;;  %v1823_v46 = vsub.s32 0, %v906_v44  ;;  %vm1114_vm4 = vcmask (!%p1263_p1), 1040384  }
  0x29   : > { %1319 = vmatmul.mubr.msk.f32.vlgmr.msra.gmra.mrb[0].mxu1 %vm411_vm1, %v408_v6  ;;  %1313 = vmatprep.mubr.msk.f32.mxu0 %vm411_vm1, %v409_v7 }
  0x2a   : > { %1321 = vmatprep.mubr.msk.f32.mxu1 %vm411_vm1, %v409_v7  ;;  %1390 = vmatprep.subr.bf16.mxu0 %v1605_v9 }
  0x2b   : > { %1396 = vmatprep.subr.bf16.mxu1 %v1605_v9  ;;  %1503 = vset.pattern.permute.xlu0 %v1608_v12 }
  0x2c   : > { %1314 = vmatmul.mubr.msk.f32.gmra.mrb[2].mxu0 %vm411_vm1, %v410_v8  ;;  %902 = vperm.xlu0 %1503, %v899_v11  }
  0x2d   : > { %1322 = vmatmul.mubr.msk.f32.gmra.mrb[2].mxu1 %vm411_vm1, %v410_v8  ;;  %1332 = vmatprep.mubr.msk.f32.mxu0 %vm1606_vm2, %v1607_v10 }
  0x2e   : > { %1343 = vmatprep.mubr.msk.f32.mxu1 %vm1606_vm2, %v1607_v10 }
  0x30   : > { %1097 = vperm.xlu0 %1503, %v1094_v13  }
  0xab   : > { %v903_v47 = vpop.permute.xlu0 %902 }
  0xac   : > { %v908_v49 = vrot.slane %v903_v47, %v1823_v46 }
  0xfb   : > { %v1764_v14 = vpop.f32.mrb[0].mxu0 }
  0xfc   : > { %v1766_v15 = vpop.f32.mrb[0].mxu1  ;;  %v603_v16 = vmul.f32 %v1764_v14, %v1764_v14  ;;  %v1772_v18 = vpop.f32.mrb[1].mxu0 }
  0xfd   : > { %v681_v17 = vmul.f32 %v1766_v15, %v1766_v15  ;;  %v1774_v19 = vpop.f32.mrb[1].mxu1  ;;  %v602_v20 = vmul.f32 %v1772_v18, %v1772_v18  ;;  %v1403_v21 = vpack.c.bf16 %v1764_v14, %v1772_v18 }
  0xfe   : > { %v680_v22 = vmul.f32 %v1774_v19, %v1774_v19  ;;  %v1409_v23 = vpack.c.bf16 %v1766_v15, %v1774_v19 }
  0xff   : > { %v1391_v24 = vpack.c.bf16 %v603_v16, %v602_v20  ;;  %v1784_v26 = vpop.f32.mrb[2].mxu0 }
 0x100   : > { %v1397_v25 = vpack.c.bf16 %v681_v17, %v680_v22  ;;  %v1786_v27 = vpop.f32.mrb[2].mxu1  ;;  %v605_v28 = vmul.f32 %v1784_v26, %v1784_v26  ;;  %v1792_v30 = vpop.f32.mrb[3].mxu0 }
 0x101   : > { %v683_v29 = vmul.f32 %v1786_v27, %v1786_v27  ;;  %v1794_v31 = vpop.f32.mrb[3].mxu1  ;;  %v604_v32 = vmul.f32 %v1792_v30, %v1792_v30  ;;  %v1406_v33 = vpack.c.bf16 %v1784_v26, %v1792_v30  ;;  %1392 = vmatpush3.bf16.msra.mxu0 %v1391_v24  ;;  %v938_v24 = vld [vmem:[%s1908_s4] sm:$0x1] }
 0x102   : > { %v682_v34 = vmul.f32 %v1794_v31, %v1794_v31  ;;  %v1412_v35 = vpack.c.bf16 %v1786_v27, %v1794_v31  ;;  %1398 = vmatpush3.bf16.msra.mxu1 %v1397_v25  ;;  %1393 = vmatprep.subr.bf16.mxu0 %v1605_v9  ;;  %v1098_v25 = vpop.permute.xlu0 %1097 }
 0x103   : > { %v1394_v36 = vpack.c.bf16 %v605_v28, %v604_v32  ;;  %1399 = vmatprep.subr.bf16.mxu1 %v1605_v9 }
 0x104   : > { %v1400_v37 = vpack.c.bf16 %v683_v29, %v682_v34 }
 0x105   : > { %1395 = vmatpush3.bf16.msra.mxu0 %v1394_v36 }
 0x106   : > { %1401 = vmatpush3.bf16.msra.mxu1 %v1400_v37  ;;  %1402 = vmatprep.subr.bf16.mxu0 %v1605_v9 }
 0x107   : > { %1408 = vmatprep.subr.bf16.mxu1 %v1605_v9 }
 0x108   : > { %1333 = vmatmul.mubr.msk.f32.vlgmr.msra.gmra.mrb[4].mxu0 %vm606_vm3, %v1609_v38 }
 0x109   : > { %1344 = vmatmul.mubr.msk.f32.vlgmr.msra.gmra.mrb[4].mxu1 %vm606_vm3, %v1609_v38  ;;  %1404 = vmatpush3.bf16.msra.mxu0 %v1403_v21 }
 0x10a   : > { %1410 = vmatpush3.bf16.msra.mxu1 %v1409_v23  ;;  %1405 = vmatprep.subr.bf16.mxu0 %v1605_v9 }
 0x10b   : > { %1411 = vmatprep.subr.bf16.mxu1 %v1605_v9  ;;  %1354 = vmatprep.mubr.msk.f32.mxu0 %vm1606_vm2, %v1607_v10 }
 0x10c   : > { %1365 = vmatprep.mubr.msk.f32.mxu1 %vm1606_vm2, %v1607_v10 }
 0x10d   : > { %1407 = vmatpush3.bf16.msra.mxu0 %v1406_v33 }
 0x10e   : > { %1413 = vmatpush3.bf16.msra.mxu1 %v1412_v35  ;;  %1414 = vmatprep.subr.bf16.mxu0 %v1605_v9  ;;  %v1106_v35 = vld [vmem:[#allocation2] sm:$0x1] }
 0x10f   : > { %1420 = vmatprep.subr.bf16.mxu1 %v1605_v9 }
 0x110   : > { %1355 = vmatmul.mubr.msk.f32.vlgmr.msra.gmra.mrb[6].mxu0 %vm606_vm3, %v601_v39 }
 0x111   : > { %1366 = vmatmul.mubr.msk.f32.vlgmr.msra.gmra.mrb[6].mxu1 %vm606_vm3, %v601_v39  ;;  %1376 = vmatprep.mubr.msk.f32.mxu0 %vm1606_vm2, %v1607_v10 }
 0x112   : > { %1387 = vmatprep.mubr.msk.f32.mxu1 %vm1606_vm2, %v1607_v10 }
 0x1db   : > { %v676_v41 = vpop.f32.mrb[4].mxu0 }
 0x1dc   : > { %v750_v42 = vpop.f32.mrb[4].mxu1  ;;  %v1334_v43 = vpop.f32.mrb[5].mxu0 }
 0x1dd   : > { %v1345_v45 = vpop.f32.mrb[5].mxu1 }
 0x1e3   : > { %v823_v48 = vpop.f32.mrb[6].mxu0 }
 0x1e4   : > { %v897_v50 = vmul.f32 2.0, %v823_v48  ;;  %v893_v51 = vpop.f32.mrb[6].mxu1  ;;  %v1356_v52 = vpop.f32.mrb[7].mxu0 }
 0x1e5   : > { %v911_v53 = vmul.f32 2.0, %v893_v51  ;;  %v1367_v54 = vpop.f32.mrb[7].mxu1 }
 0x1e6   : > { %v898_v55 = vsub.f32 %v676_v41, %v897_v50 }
 0x1e7   : > { %v912_v56 = vsub.f32 %v750_v42, %v911_v53 }
 0x1e8   : > { %v909_v57 = vadd.f32 %v908_v49, %v898_v55 }
 0x1e9   : > { %v913_v58 = vadd.f32 %v912_v56, %v908_v49 }
 0x1ea   : > { %v910_v59 = vmax.f32 %v909_v57, 2.5e-11 }
 0x1eb   : > { %v914_v60 = vmax.f32 %v913_v58, 2.5e-11 }
 0x1ec   : > { %1504 = vrsqrt.f32 %v910_v59 }
 0x1ed   : > { %1506 = vrsqrt.f32 %v914_v60 }
 0x1f6   : > { %v1505_v61 = vpop.eup %1504 }
 0x1f7   : > { %v1507_v62 = vpop.eup %1506  ;;  %v920_v63 = vrot.slane %v1505_v61, %v1823_v46 }
 0x1f8   : > { %v928_v0 = vrot.slane %v1507_v62, %v1823_v46  ;;  %v937_v1 = vsub.f32 %v1505_v61, %v1507_v62 }
 0x1f9   : > { %v921_v2 = vmul.f32 %v920_v63, %v1772_v18  ;;  %v922_v3 = vmul.f32 %v1764_v14, %v920_v63  ;;  %v923_v4 = vmul.f32 %v920_v63, %v1792_v30  ;;  %v924_v5 = vmul.f32 %v1784_v26, %v920_v63 }
 0x1fa   : > { %v929_v6 = vmul.f32 %v928_v0, %v1774_v19  ;;  %v930_v7 = vmul.f32 %v1766_v15, %v928_v0  ;;  %v931_v8 = vmul.f32 %v928_v0, %v1794_v31  ;;  %v932_v10 = vmul.f32 %v1786_v27, %v928_v0  ;;  %v1016_v15 = vld [vmem:[%s1909_s5] sm:$0x1] }
 0x1fb   : > { %v1093_v26 = vmul.f32 %v937_v1, %v937_v1  ;;  %v1090_v27 = vmul.f32 2.0, %v937_v1 }
 0x1fc   : > { %v933_v11 = vsub.f32 %v921_v2, %v929_v6  ;;  %v934_v12 = vsub.f32 %v922_v3, %v930_v7  ;;  %v935_v13 = vsub.f32 %v923_v4, %v931_v8  ;;  %v936_v16 = vsub.f32 %v924_v5, %v932_v10 }
 0x1fe   : > { %v1421_v17 = vpack.c.bf16 %v934_v12, %v933_v11  ;;  %v939_v18 = vmul.f32 %v933_v11, %v933_v11  ;;  %v940_v20 = vmul.f32 %v934_v12, %v934_v12  ;;  %v941_v14 = vmul.f32 %v935_v13, %v935_v13 }
 0x1ff   : > { %v1424_v21 = vpack.c.bf16 %v936_v16, %v935_v13  ;;  %v942_v22 = vmul.f32 %v936_v16, %v936_v16 }
 0x200   : > { %1422 = vmatpush3.bf16.msra.mxu1 %v1421_v17  ;;  %v1415_v23 = vpack.c.bf16 %v940_v20, %v939_v18 }
 0x201   : > { %1423 = vmatprep.subr.bf16.mxu1 %v1605_v9  ;;  %v1418_v19 = vpack.c.bf16 %v942_v22, %v941_v14 }
 0x202   : > { %1416 = vmatpush3.bf16.msra.mxu0 %v1415_v23 }
 0x203   : > { %1417 = vmatprep.subr.bf16.mxu0 %v1605_v9  ;;  %v1103_v9 = vrot.slane %v1098_v25, %v1823_v46 }
 0x204   : > { %1425 = vmatpush3.bf16.msra.mxu1 %v1424_v21 }
 0x205   : > { %v1104_v32 = vmul.f32 %v1103_v9, %v1093_v26 }
 0x206   : > { %1419 = vmatpush3.bf16.msra.mxu0 %v1418_v19 }
 0x207   : > { %1388 = vmatmul.mubr.msk.f32.vlgmr.msra.gmra.mrb[8].mxu1 %vm606_vm3, %v1016_v15 }
 0x209   : > { %1377 = vmatmul.mubr.msk.f32.vlgmr.msra.gmra.mrb[8].mxu0 %vm606_vm3, %v938_v24 }
 0x2da   : > { %v1086_v28 = vpop.f32.mrb[8].mxu1 }
 0x2db   : > { %v1091_v29 = vmul.f32 %v1090_v27, %v1086_v28  ;;  %v1389_v30 = vpop.f32.mrb[9].mxu1 }
 0x2dc   : > { %v1012_v31 = vpop.f32.mrb[8].mxu0 }
 0x2dd   : > { %v1092_v33 = vsub.f32 %v1012_v31, %v1091_v29  ;;  %v1378_v34 = vpop.f32.mrb[9].mxu0  ;;  %1112 = sbr.rel (%p1263_p1) target bundleno = 893 (0x37d), region = 60 }
 0x2df   : > { %v1105_v36 = vadd.f32 %v1104_v32, %v1092_v33 }
 0x2e1   : > { %v1107_v37 = vadd.f32 %v1106_v35, %v1105_v36 }
 0x2e3   : > { %1108 = vst [vmem:[#allocation2] sm:$0x1] %v1107_v37 }
 0x2ea   : > { %v1113_v38 = vld [vmem:[#allocation2] sm:$0x1] }
 0x2eb   : > { %v1115_v39 = vsel %vm1114_vm4, %v1113_v38, 0.0 }
 0x2ec   : > { %1116 = vadd.xlane.f32.xlu0 %v1115_v39 }
 0x379   : > { %v1117_v40 = vpop.xlane.xlu0 %1116 }
 0x37a   : > { %v1121_v41 = vrot.slane %v1117_v40, %v1823_v46 }
 0x37c   : > { %1122 = vst [vmem:[%s1744_s6] sm:$0xff] %v1121_v41 }
 0x37d PF: > { %s1265_s18 = sshll.u32 %s1590_s13, 7  ;;  %s1138_s29 = sshll.u32 %s1744_s6, 4  ;;  %s1139_s29 = int_to_ptr.vmem [resolvable:$true] %s1138_s29 }
 0x37e   : > { %s1854_s12 = scalar_lea.hbm %s1911_s8, %s1265_s18  ;;  %s1124_s17 = scalar_lea.sflag [#allocation6], %s372_s24 }
 0x37f   : > { %s1508_s30 = scalar_lea.vmem %s1139_s29, 128  ;;  %s1610_s7 = smov [#allocation5]  }
 0x380   : > { %p1509_p2 = scmp.ne.s32.totalorder %s1139_s29, %s1508_s30  ;;  %s1512_s16 = sshll.u32 %s1610_s7, 4  ;;  %s1513_s16 = int_to_ptr.vmem [resolvable:$false] %s1512_s16 }
 0x381   : > { %s1514_s21 = scalar_lea.vmem %s1513_s16, 256  ;;  %p1515_p6 = scmp.lt.s32.totalorder %s1139_s29, %s1513_s16 }
 0x382   : > { %p1510_p4 = pnand %p1509_p2, %p1711_p3  ;;  %p1516_p7 = scmp.lt.s32.totalorder %s1514_s21, %s1508_s30 }
 0x384   : > { %p1511_p5 = pneg %p1510_p4  ;;  %p1517_p8 = por %p1516_p7, %p1515_p6 }
 0x386   : > { %p1518_p10 = pnand %p1517_p8, %p1511_p5 }
 0x388   : > { %1521 = shalt.err (!%p1518_p10)
}
 0x389   : > { %s1522_s13 = scalar_lea.hbm %s1854_s12, 128  ;;  %s1526_s22 = scalar_lea.hbm %s1911_s8, 256 }
 0x38a   : > { %p1523_p11 = scmp.ne.s32.totalorder %s1854_s12, %s1522_s13  ;;  %p1527_p0 = scmp.lt.u32.totalorder %s1854_s12, %s1911_s8 }
 0x38b   : > { %p1528_p1 = scmp.lt.u32.totalorder %s1526_s22, %s1522_s13  ;;  %p1530_p4 = scmp.lt.u32.totalorder %s1522_s13, %s1854_s12 }
 0x38c   : > { %p1524_p12 = pnand %p1523_p11, %p1711_p3 }
 0x38d   : > { %p1529_p2 = por %p1528_p1, %p1527_p0 }
 0x38e   : > { %p1525_p13 = pneg %p1524_p12 }
 0x38f   : > { %p1531_p5 = por %p1530_p4, %p1529_p2 }
 0x391   : > { %p1532_p6 = pnand %p1531_p5, %p1525_p13 }
 0x393   : > { %1535 = shalt.err (!%p1532_p6)
}
 0x394   : > { %1426 = dma.vmem_to_hbm [thread:$0]  (%p1711_p3), %s1139_s29, 128, %s1854_s12, %s1124_s17  }
 0x395 PF: > { %p1432_p7 = scmp.ge.s32.totalorder %s1602_s15, 2  ;;  %s1150_s18 = sand.u32 1, %s1574_s9  }
 0x396   : > { %s1151_s25 = scalar_lea.sflag [#allocation6], %s1150_s18 }
 0x397   : > { %p1429_p8 = pnand %p1432_p7, %p1721_p9 }
 0x399   : > { %1569 = dma.done.wait (!%p1429_p8), %s1151_s25, 128  }
 0x39a   : > { %1571 = vsyncadd (!%p1429_p8), %s1151_s25, 4294967168  ;;  %s25_s15 = sadd.s32 1, %s1602_s15   ;;  %s1920_s13 = sld [smem:[#allocation8_spill]] }
 0x39b   : > { %p22_p10 = scmp.ge.s32.totalorder %s25_s15, 6   ;;  %s1921_s19 = sld [smem:[#allocation9_spill]] }
 0x39c   : > { %s1922_s6 = sld [smem:[#allocation10_spill]]  ;;  %s1923_s9 = smov %s1578_s10 }
 0x39d   : > { %s1924_s10 = smov %s1582_s11  ;;  %s1925_s11 = smov %s1729_s23 }
 0x39e   : > { %s1926_s12 = smov %s1594_s14  ;;  %24 = sbr.rel (!%p22_p10) target bundleno = 8 (0x8), region = 98 }
 0x3a1   : > { %s1927_s14 = smov %s1921_s19 }
 0x3a5   :  { %1156 = vsyncpa [#allocation6], 1 }
 0x3a6   :  { %1158 = vsyncpa [#allocation6 + $0x1], 1 }

</bundles_post_ra>
